<compile_context>
chip_gen: v7x
topology: tpu7x:2x2x1
jax: 0.10.0
libtpu: 0.0.40
codegen_flags: <defaults>
</compile_context>

<pallas_src>
import jax
import jax.numpy as jnp
from jax.experimental import pallas as pl
from jax.experimental.pallas import tpu as pltpu


def _fused_gcn_kernel(adj_ref, x_ref, w_ref, o_ref, support_ref):
    """One grid step computes a (tm, F_out) slab of  adj @ (x @ W).

    adj_ref     : (tm, N)       f32   -- row slab of the adjacency
    x_ref       : (N, F_in)     f32   -- full node features (resident)
    w_ref       : (F_in, F_out) f32   -- full weight         (resident)
    o_ref       : (tm, F_out)   f32   -- output slab
    support_ref : (N, F_out)    bf16  -- VMEM scratch for x @ W
    """
    # support = x @ W : cast operands to bf16 in-kernel (VPU), accumulate in
    # f32 on the MXU, store the result once as bf16 scratch.
    support_ref[...] = jnp.dot(
        x_ref[...].astype(jnp.bfloat16),
        w_ref[...].astype(jnp.bfloat16),
        preferred_element_type=jnp.float32,
    ).astype(jnp.bfloat16)

    # out_slab = adj_slab @ support : bf16 MXU path, f32 accumulate, f32 store.
    o_ref[...] = jnp.dot(
        adj_ref[...].astype(jnp.bfloat16),
        support_ref[...],
        preferred_element_type=jnp.float32,
    ).astype(o_ref.dtype)


def _num_tensorcores_per_chip() -> int:
    """Best-effort TC count: 2 on v7x, 1 on v5e/v6e (and on any failure)."""
    try:
        kind = jax.devices()[0].device_kind.lower()
    except Exception:  # pragma: no cover - defensive only
        return 1
    return 2 if "v7" in kind else 1


def _fused_gcn(adj, x, weight):
    """output = adj @ (x @ weight), fused into one pallas_call (f32 in/out)."""
    N, F_in = x.shape
    F_out = weight.shape[1]
    assert adj.shape == (N, N)
    assert weight.shape[0] == F_in

    # Chip-aware row tiling:
    #   * single-TC chips (v5e/v6e): one grid step (tm = N) -> no per-step
    #     pipeline overhead, no x@W recompute, and M = N fills the MXU better.
    #   * v7x (2 TCs): split rows in two "parallel" slabs so both cores work.
    ncores = _num_tensorcores_per_chip()
    if ncores >= 2 and N % (ncores * 128) == 0:
        tm = N // ncores
    else:
        tm = N
    assert N % tm == 0
    grid = (N // tm,)

    return pl.pallas_call(
        _fused_gcn_kernel,
        out_shape=jax.ShapeDtypeStruct((N, F_out), jnp.float32),
        grid_spec=pltpu.PrefetchScalarGridSpec(
            num_scalar_prefetch=0,
            grid=grid,
            in_specs=[
                # adj row slab changes per grid step (f32; cast in-kernel).
                pl.BlockSpec((tm, N), lambda i: (i, 0)),
                # x and W identical every step -> DMA'd once, stay resident.
                pl.BlockSpec((N, F_in), lambda i: (0, 0)),
                pl.BlockSpec((F_in, F_out), lambda i: (0, 0)),
            ],
            out_specs=pl.BlockSpec((tm, F_out), lambda i: (i, 0)),
            # bf16 support scratch (N x F_out x 2 B = 64 KiB at toy shapes).
            scratch_shapes=[pltpu.VMEM((N, F_out), jnp.bfloat16)],
        ),
        compiler_params=pltpu.CompilerParams(
            dimension_semantics=("parallel",)),
    )(adj, x, weight)


@jax.jit
def graph_random_convolution(x, adj, weight):
    """GraphConvolution forward: adj @ (x @ weight), as one fused TPU kernel.

    Inputs stay f32 all the way into the kernel; bf16 casts happen on-chip so
    the adjacency only crosses HBM once.  Accumulation is f32 on the MXU.
    """
    return _fused_gcn(adj, x, weight)


if __name__ == "__main__":
    N, F_IN, F_OUT = 256, 128, 128

    key = jax.random.PRNGKey(0)
    kx, ka, kw = jax.random.split(key, 3)

    # node features
    x = jax.random.normal(kx, (N, F_IN), dtype=jnp.float32)

    # synthetic dense adjacency with self-loops, row-normalized
    a_raw = (jax.random.uniform(ka, (N, N)) < 0.05).astype(jnp.float32)
    a_raw = a_raw + jnp.eye(N, dtype=jnp.float32)
    adj = a_raw / jnp.sum(a_raw, axis=1, keepdims=True)

    # deterministic "random" weight (pygcn-style uniform(-1/sqrt(F_out), ...))
    bound = 1.0 / (F_OUT ** 0.5)
    weight = jax.random.uniform(kw, (F_IN, F_OUT), dtype=jnp.float32,
                                minval=-bound, maxval=bound)

    out = graph_random_convolution(x, adj, weight)
    out = jax.block_until_ready(out)

    # plain-JAX f32 reference; tolerance relaxed because the kernel runs the
    # MXU in bf16 (accumulation is still f32).
    ref = adj @ (x @ weight)
    assert out.shape == (N, F_OUT)
    assert jnp.allclose(out, ref, atol=3e-2, rtol=3e-2)

    print("KERNEL_OK")
</pallas_src>

<mosaic_0001>
module attributes {stable_mosaic.version = 11 : i64} {
  func.func @_fused_gcn_kernel(%arg0: i32, %arg1: memref<256x256xf32, #tpu.memory_space<vmem>>, %arg2: memref<256x128xf32, #tpu.memory_space<vmem>>, %arg3: memref<128x128xf32, #tpu.memory_space<vmem>>, %arg4: memref<256x128xf32, #tpu.memory_space<vmem>>, %arg5: memref<256x128xbf16, #tpu.memory_space<vmem>>) attributes {dimension_semantics = [#tpu.dimension_semantics<parallel>], iteration_bounds = array<i64: 1>, scalar_prefetch = 0 : i64, scratch_operands = 1 : i64, tpu.core_type = #tpu.core_type<tc>, window_params = [{transform_indices = @transform_0, window_bounds = array<i64: 256, 256>}, {pipeline_mode = #tpu.pipeline_mode<synchronous>, transform_indices = @transform_1, window_bounds = array<i64: 256, 128>}, {pipeline_mode = #tpu.pipeline_mode<synchronous>, transform_indices = @transform_2, window_bounds = array<i64: 128, 128>}, {transform_indices = @transform_3, window_bounds = array<i64: 256, 128>}]} {
    %c0 = arith.constant 0 : index
    %c0_0 = arith.constant 0 : index
    %0 = vector.load %arg2[%c0, %c0_0] : memref<256x128xf32, #tpu.memory_space<vmem>>, vector<256x128xf32>
    %1 = arith.truncf %0 : vector<256x128xf32> to vector<256x128xbf16>
    %c0_1 = arith.constant 0 : index
    %c0_2 = arith.constant 0 : index
    %2 = vector.load %arg3[%c0_1, %c0_2] : memref<128x128xf32, #tpu.memory_space<vmem>>, vector<128x128xf32>
    %3 = arith.truncf %2 : vector<128x128xf32> to vector<128x128xbf16>
    %cst = arith.constant dense<0.000000e+00> : vector<256x128xf32>
    %4 = tpu.matmul %1, %3, %cst {dimension_numbers = #tpu.dot_dimension_numbers<[1], [0], [0], [1], [0, 0, 1, 1], [], []>} : vector<256x128xbf16>, vector<128x128xbf16>, vector<256x128xf32> -> vector<256x128xf32>
    %5 = arith.truncf %4 : vector<256x128xf32> to vector<256x128xbf16>
    %c0_3 = arith.constant 0 : index
    %c0_4 = arith.constant 0 : index
    %6 = vector.load %arg5[%c0_3, %c0_4] : memref<256x128xbf16, #tpu.memory_space<vmem>>, vector<256x128xbf16>
    tpu.vector_store %arg5[%c0_3, %c0_4], %5 {strides = array<i32>} : memref<256x128xbf16, #tpu.memory_space<vmem>>, vector<256x128xbf16>,
    %c0_5 = arith.constant 0 : index
    %c0_6 = arith.constant 0 : index
    %7 = vector.load %arg1[%c0_5, %c0_6] : memref<256x256xf32, #tpu.memory_space<vmem>>, vector<256x256xf32>
    %8 = arith.truncf %7 : vector<256x256xf32> to vector<256x256xbf16>
    %c0_7 = arith.constant 0 : index
    %c0_8 = arith.constant 0 : index
    %9 = vector.load %arg5[%c0_7, %c0_8] : memref<256x128xbf16, #tpu.memory_space<vmem>>, vector<256x128xbf16>
    %cst_9 = arith.constant dense<0.000000e+00> : vector<256x128xf32>
    %10 = tpu.matmul %8, %9, %cst_9 {dimension_numbers = #tpu.dot_dimension_numbers<[1], [0], [0], [1], [0, 0, 1, 1], [], []>} : vector<256x256xbf16>, vector<256x128xbf16>, vector<256x128xf32> -> vector<256x128xf32>
    %c0_10 = arith.constant 0 : index
    %c0_11 = arith.constant 0 : index
    %11 = vector.load %arg4[%c0_10, %c0_11] : memref<256x128xf32, #tpu.memory_space<vmem>>, vector<256x128xf32>
    tpu.vector_store %arg4[%c0_10, %c0_11], %10 {strides = array<i32>} : memref<256x128xf32, #tpu.memory_space<vmem>>, vector<256x128xf32>,
    return
  }
  func.func @transform_0(%arg0: i32) -> (i32, i32) {
    %c0_i32 = arith.constant 0 : i32
    %c0_i32_0 = arith.constant 0 : i32
    return %arg0, %c0_i32 : i32, i32
  }
  func.func @transform_1(%arg0: i32) -> (i32, i32) {
    %c0_i32 = arith.constant 0 : i32
    %c0_i32_0 = arith.constant 0 : i32
    %c0_i32_1 = arith.constant 0 : i32
    return %c0_i32, %c0_i32_0 : i32, i32
  }
  func.func @transform_2(%arg0: i32) -> (i32, i32) {
    %c0_i32 = arith.constant 0 : i32
    %c0_i32_0 = arith.constant 0 : i32
    %c0_i32_1 = arith.constant 0 : i32
    return %c0_i32, %c0_i32_0 : i32, i32
  }
  func.func @transform_3(%arg0: i32) -> (i32, i32) {
    %c0_i32 = arith.constant 0 : i32
    %c0_i32_0 = arith.constant 0 : i32
    return %arg0, %c0_i32 : i32, i32
  }
}

</mosaic_0001>

<bundles_post_ra>
// kernel: graph_random_convolution.1
= control target key start
LH: loop header
LB: loop body
LE: loop exit
PB: predicated region body
PF: predicated region fallthrough
CT: control target
= control target key end

     0   :  { %8 = vsyncpa [#allocation4], 0  ;;  %s1036_s0 = inlined_call_operand.hbm [shape: f32[256,256], index: 0, kind: input, shape index: {}]   ;;  %s1037_s1 = inlined_call_operand.hbm [shape: f32[256,128], index: 1, kind: input, shape index: {}]   ;;  %s1038_s2 = inlined_call_operand.hbm [shape: f32[128,128], index: 2, kind: input, shape index: {}]   ;;  %s1039_s3 = inlined_call_operand.hbm [shape: f32[256,128], index: 3, kind: output, shape index: {}]  }
   0x1   :  { %9 = vsyncpa [#allocation7], 0 }
   0x2   :  { %10 = vsyncpa [#allocation5], 0  ;;  %s947_s12 = smov [#allocation6]   ;;  %s853_s16 = scalar_lea.hbm %s1037_s1, 4096 }
   0x3   :  { %s28_s13 = sshll.u32 %s947_s12, 4  ;;  %p854_p0 = scmp.ne.s32.totalorder %s1037_s1, %s853_s16  ;;  %s29_s13 = int_to_ptr.vmem [resolvable:$true] %s28_s13 }
   0x4   :  { %p857_p1 = scmp.lt.u32.totalorder %s853_s16, %s1037_s1 }
   0x6   :  { %p859_p2 = pnand %p857_p1, %p854_p0 }
   0x8   :  { %862 = shalt.err (!%p859_p2)
}
   0x9   :  { %s863_s21 = scalar_lea.vmem %s29_s13, 4096  ;;  %p868_p4 = scmp.lt.s32.totalorder %s29_s13, %s29_s13 }
   0xa   :  { %p864_p3 = scmp.ne.s32.totalorder %s29_s13, %s863_s21  ;;  %p869_p5 = scmp.lt.s32.totalorder %s863_s21, %s863_s21 }
   0xc   :  { %p870_p6 = por %p869_p5, %p868_p4 }
   0xe   :  { %p871_p7 = pnand %p870_p6, %p864_p3 }
  0x10   :  { %874 = shalt.err (!%p871_p7)
}
  0x11   :  { %s948_s22 = smov 128   ;;  %s949_s23 = smov 8  }
  0x12   :  { %34 = dma.hbm_to_vmem [thread:$0]  %s1037_s1, 4096, %s29_s13, [#allocation7], %s948_s22, %s948_s22, %s949_s23  }
  0x13   :  { %s950_s26 = smov [#allocation3]   ;;  %s875_s30 = scalar_lea.hbm %s1036_s0, 8192 }
  0x14   :  { %s16_s27 = sshll.u32 %s950_s26, 4  ;;  %p876_p8 = scmp.ne.s32.totalorder %s1036_s0, %s875_s30  ;;  %s17_s27 = int_to_ptr.vmem [resolvable:$true] %s16_s27 }
  0x15   :  { %p879_p9 = scmp.lt.u32.totalorder %s875_s30, %s1036_s0 }
  0x17   :  { %p881_p10 = pnand %p879_p9, %p876_p8 }
  0x19   :  { %884 = shalt.err (!%p881_p10)
}
  0x1a   :  { %s885_s8 = scalar_lea.vmem %s17_s27, 8192  ;;  %p890_p12 = scmp.lt.s32.totalorder %s17_s27, %s17_s27 }
  0x1b   :  { %p886_p11 = scmp.ne.s32.totalorder %s17_s27, %s885_s8  ;;  %p891_p13 = scmp.lt.s32.totalorder %s885_s8, %s885_s8 }
  0x1d   :  { %p892_p0 = por %p891_p13, %p890_p12 }
  0x1f   :  { %p893_p1 = pnand %p892_p0, %p886_p11 }
  0x21   :  { %896 = shalt.err (!%p893_p1)
}
  0x22   :  { %s951_s1 = smov 256   ;;  %s952_s9 = smov 16  }
  0x23   :  { %22 = dma.hbm_to_vmem [thread:$0]  %s1036_s0, 8192, %s17_s27, [#allocation4], %s951_s1, %s951_s1, %s952_s9  }
  0x24   :  { %s953_s12 = smov [#allocation8]   ;;  %s897_s16 = scalar_lea.hbm %s1038_s2, 2048 }
  0x25   :  { %s40_s13 = sshll.u32 %s953_s12, 4  ;;  %p898_p2 = scmp.ne.s32.totalorder %s1038_s2, %s897_s16  ;;  %s41_s13 = int_to_ptr.vmem [resolvable:$true] %s40_s13 }
  0x26   :  { %p901_p3 = scmp.lt.u32.totalorder %s897_s16, %s1038_s2 }
  0x28   :  { %p903_p4 = pnand %p901_p3, %p898_p2 }
  0x2a   :  { %906 = shalt.err (!%p903_p4)
}
  0x2b   :  { %s907_s21 = scalar_lea.vmem %s41_s13, 2048  ;;  %p912_p6 = scmp.lt.s32.totalorder %s41_s13, %s41_s13 }
  0x2c   :  { %p908_p5 = scmp.ne.s32.totalorder %s41_s13, %s907_s21  ;;  %p913_p7 = scmp.lt.s32.totalorder %s907_s21, %s907_s21 }
  0x2e   :  { %p914_p8 = por %p913_p7, %p912_p6 }
  0x30   :  { %p915_p9 = pnand %p914_p8, %p908_p5 }
  0x32   :  { %918 = shalt.err (!%p915_p9)
}
  0x33   :  { %46 = dma.hbm_to_vmem [thread:$0]  %s1038_s2, 2048, %s41_s13, [#allocation7], %s948_s22, %s948_s22, %s949_s23  }
  0x34   :  { %941 = dma.done.wait [#allocation4], 8192  }
  0x35   :  { %942 = vsyncadd [#allocation4], 4294959104 }
  0x36   :  { %943 = dma.done.wait [#allocation7], 6144  }
  0x37   :  { %944 = vsyncadd [#allocation7], 4294961152  ;;  %v105_v0 = vld [vmem:[#allocation8] sm:$0xff]  ;;  %v106_v1 = vld [vmem:[#allocation8 + $0x8] sm:$0xff]  ;;  %s954_s2 = smov [#allocation9]  }
  0x38   :  { %v107_v2 = vld [vmem:[#allocation8 + $0x10] sm:$0xff]  ;;  %v121_v3 = vpack.c.bf16 %v106_v1, %v105_v0  ;;  %v108_v4 = vld [vmem:[#allocation8 + $0x18] sm:$0xff]  ;;  %v109_v6 = vld [vmem:[#allocation8 + $0x20] sm:$0xff]  ;;  %s632_s25 = sshll.u32 %s954_s2, 4  ;;  %s633_s25 = int_to_ptr.vmem [resolvable:$true] %s632_s25 }
  0x39   :  { %v122_v5 = vpack.c.bf16 %v108_v4, %v107_v2  ;;  %v110_v7 = vld [vmem:[#allocation8 + $0x28] sm:$0xff]  ;;  %v57_v9 = vld [vmem:[#allocation6] sm:$0xff]  ;;  %v111_v11 = vld [vmem:[#allocation8 + $0x30] sm:$0xff]  ;;  %s919_s26 = scalar_lea.vmem %s633_s25, 4096  ;;  %p924_p11 = scmp.lt.s32.totalorder %s633_s25, %s633_s25 }
  0x3a   :  { %781 = vmatprep.subr.bf16.mxu0 %v121_v3  ;;  %v123_v8 = vpack.c.bf16 %v110_v7, %v109_v6  ;;  %v58_v10 = vld [vmem:[#allocation6 + $0x8] sm:$0xff]  ;;  %v112_v12 = vld [vmem:[#allocation8 + $0x38] sm:$0xff]  ;;  %v113_v15 = vld [vmem:[#allocation8 + $0x40] sm:$0xff]  ;;  %p920_p10 = scmp.ne.s32.totalorder %s633_s25, %s919_s26  ;;  %p925_p12 = scmp.lt.s32.totalorder %s919_s26, %s919_s26 }
  0x3b   :  { %782 = vmatpush3.bf16.msra.mxu0 %v121_v3  ;;  %v89_v13 = vpack.c.bf16 %v58_v10, %v57_v9  ;;  %v124_v14 = vpack.c.bf16 %v112_v12, %v111_v11  ;;  %v114_v16 = vld [vmem:[#allocation8 + $0x48] sm:$0xff]  ;;  %v115_v18 = vld [vmem:[#allocation8 + $0x50] sm:$0xff]  ;;  %v116_v19 = vld [vmem:[#allocation8 + $0x58] sm:$0xff] }
  0x3c   :  { %783 = vmatprep.subr.bf16.mxu0 %v122_v5  ;;  %v125_v17 = vpack.c.bf16 %v114_v16, %v113_v15  ;;  %v126_v20 = vpack.c.bf16 %v116_v19, %v115_v18  ;;  %v117_v21 = vld [vmem:[#allocation8 + $0x60] sm:$0xff]  ;;  %v118_v22 = vld [vmem:[#allocation8 + $0x68] sm:$0xff]  ;;  %v119_v24 = vld [vmem:[#allocation8 + $0x70] sm:$0xff]  ;;  %p926_p13 = por %p925_p12, %p924_p11 }
  0x3d   :  { %797 = vmatprep.mubr.bf16.mxu0 %v89_v13  ;;  %v127_v23 = vpack.c.bf16 %v118_v22, %v117_v21  ;;  %v120_v25 = vld [vmem:[#allocation8 + $0x78] sm:$0xff]  ;;  %v59_v27 = vld [vmem:[#allocation6 + $0x10] sm:$0xff]  ;;  %v61_v29 = vld [vmem:[#allocation6 + $0x20] sm:$0xff] }
  0x3e   :  { %v128_v26 = vpack.c.bf16 %v120_v25, %v119_v24  ;;  %v60_v28 = vld [vmem:[#allocation6 + $0x18] sm:$0xff]  ;;  %v62_v30 = vld [vmem:[#allocation6 + $0x28] sm:$0xff]  ;;  %v63_v33 = vld [vmem:[#allocation6 + $0x30] sm:$0xff]  ;;  %p927_p0 = pnand %p926_p13, %p920_p10 }
  0x3f   :  { %784 = vmatpush3.bf16.msra.mxu0 %v122_v5  ;;  %v90_v31 = vpack.c.bf16 %v60_v28, %v59_v27  ;;  %v91_v32 = vpack.c.bf16 %v62_v30, %v61_v29  ;;  %v64_v34 = vld [vmem:[#allocation6 + $0x38] sm:$0xff]  ;;  %v65_v35 = vld [vmem:[#allocation6 + $0x40] sm:$0xff]  ;;  %v66_v36 = vld [vmem:[#allocation6 + $0x48] sm:$0xff] }
  0x40   :  { %785 = vmatprep.subr.bf16.mxu0 %v123_v8  ;;  %v92_v37 = vpack.c.bf16 %v64_v34, %v63_v33  ;;  %v93_v38 = vpack.c.bf16 %v66_v36, %v65_v35  ;;  %v67_v39 = vld [vmem:[#allocation6 + $0x50] sm:$0xff]  ;;  %v68_v40 = vld [vmem:[#allocation6 + $0x58] sm:$0xff]  ;;  %v69_v41 = vld [vmem:[#allocation6 + $0x60] sm:$0xff] }
  0x41   :  { %v70_v42 = vld [vmem:[#allocation6 + $0x68] sm:$0xff]  ;;  %v94_v43 = vpack.c.bf16 %v68_v40, %v67_v39  ;;  %v71_v45 = vld [vmem:[#allocation6 + $0x70] sm:$0xff]  ;;  %v72_v46 = vld [vmem:[#allocation6 + $0x78] sm:$0xff] }
  0x42   :  { %v95_v44 = vpack.c.bf16 %v70_v42, %v69_v41  ;;  %v73_v47 = vld [vmem:[#allocation6 + $0x80] sm:$0xff]  ;;  %v74_v48 = vld [vmem:[#allocation6 + $0x88] sm:$0xff]  ;;  %v96_v49 = vpack.c.bf16 %v72_v46, %v71_v45  ;;  %v75_v51 = vld [vmem:[#allocation6 + $0x90] sm:$0xff] }
  0x43   :  { %786 = vmatpush3.bf16.msra.mxu0 %v123_v8  ;;  %v97_v50 = vpack.c.bf16 %v74_v48, %v73_v47  ;;  %v76_v52 = vld [vmem:[#allocation6 + $0x98] sm:$0xff]  ;;  %v77_v53 = vld [vmem:[#allocation6 + $0xa0] sm:$0xff]  ;;  %v78_v54 = vld [vmem:[#allocation6 + $0xa8] sm:$0xff] }
  0x44   :  { %787 = vmatprep.subr.bf16.mxu0 %v124_v14  ;;  %v98_v55 = vpack.c.bf16 %v76_v52, %v75_v51  ;;  %v99_v56 = vpack.c.bf16 %v78_v54, %v77_v53  ;;  %v79_v57 = vld [vmem:[#allocation6 + $0xb0] sm:$0xff]  ;;  %v80_v58 = vld [vmem:[#allocation6 + $0xb8] sm:$0xff]  ;;  %v81_v59 = vld [vmem:[#allocation6 + $0xc0] sm:$0xff] }
  0x45   :  { %v82_v60 = vld [vmem:[#allocation6 + $0xc8] sm:$0xff]  ;;  %v100_v61 = vpack.c.bf16 %v80_v58, %v79_v57  ;;  %v83_v63 = vld [vmem:[#allocation6 + $0xd0] sm:$0xff]  ;;  %v84_v0 = vld [vmem:[#allocation6 + $0xd8] sm:$0xff] }
  0x46   :  { %v101_v62 = vpack.c.bf16 %v82_v60, %v81_v59  ;;  %v85_v1 = vld [vmem:[#allocation6 + $0xe0] sm:$0xff]  ;;  %v86_v2 = vld [vmem:[#allocation6 + $0xe8] sm:$0xff]  ;;  %v102_v3 = vpack.c.bf16 %v84_v0, %v83_v63  ;;  %v87_v5 = vld [vmem:[#allocation6 + $0xf0] sm:$0xff] }
  0x47   :  { %788 = vmatpush3.bf16.msra.mxu0 %v124_v14  ;;  %v103_v4 = vpack.c.bf16 %v86_v2, %v85_v1  ;;  %v88_v6 = vld [vmem:[#allocation6 + $0xf8] sm:$0xff]  ;;  %v339_v8 = vld [vmem:[#allocation3 + $0x88] sm:$0xff]  ;;  %v340_v63 = vld [vmem:[#allocation3 + $0x90] sm:$0xff] }
  0x48   :  { %789 = vmatprep.subr.bf16.mxu0 %v125_v17  ;;  %v104_v7 = vpack.c.bf16 %v88_v6, %v87_v5  ;;  %v341_v9 = vld [vmem:[#allocation3 + $0x98] sm:$0xff]  ;;  %v323_v11 = vld [vmem:[#allocation3 + $0x8] sm:$0xff]  ;;  %v322_v1 = vld [vmem:[#allocation3] sm:$0xff] }
  0x49   :  { %v395_v10 = vpack.c.bf16 %v341_v9, %v339_v8  ;;  %v325_v12 = vld [vmem:[#allocation3 + $0x18] sm:$0xff]  ;;  %v343_v0 = vld [vmem:[#allocation3 + $0xa8] sm:$0xff]  ;;  %v324_v2 = vld [vmem:[#allocation3 + $0x10] sm:$0xff] }
  0x4a   :  { %v387_v13 = vpack.c.bf16 %v325_v12, %v323_v11  ;;  %v329_v5 = vld [vmem:[#allocation3 + $0x38] sm:$0xff]  ;;  %v344_v11 = vld [vmem:[#allocation3 + $0xb0] sm:$0xff]  ;;  %v347_v12 = vld [vmem:[#allocation3 + $0xc8] sm:$0xff] }
  0x4b   :  { %790 = vmatpush3.bf16.msra.mxu0 %v125_v17  ;;  %498 = vmatprep.mubr.bf16.mxu1 %v395_v10  ;;  %v342_v10 = vld [vmem:[#allocation3 + $0xa0] sm:$0xff] }
  0x4c   :  { %791 = vmatprep.subr.bf16.mxu0 %v126_v20 }
  0x4f   :  { %792 = vmatpush3.bf16.msra.mxu0 %v126_v20 }
  0x50   :  { %793 = vmatprep.subr.bf16.mxu0 %v127_v23 }
  0x53   :  { %794 = vmatpush3.bf16.msra.mxu0 %v127_v23 }
  0x54   :  { %795 = vmatprep.subr.bf16.mxu0 %v128_v26 }
  0x57   :  { %796 = vmatpush3.bf16.msra.mxu0 %v128_v26 }
  0x5a   :  { %798 = vmatmul.mubr.bf16.vlgmr.msra.gmra.mrb[0].mxu0 %v90_v31 }
  0x5b   :  { %801 = vmatprep.mubr.bf16.mxu0 %v91_v32 }
  0x62   :  { %802 = vmatmul.mubr.bf16.gmra.mrb[4].mxu0 %v92_v37 }
  0x63   :  { %805 = vmatprep.mubr.bf16.mxu0 %v93_v38 }
  0x6a   :  { %806 = vmatmul.mubr.bf16.gmra.mrb[8].mxu0 %v94_v43 }
  0x6b   :  { %809 = vmatprep.mubr.bf16.mxu0 %v95_v44 }
  0x72   :  { %810 = vmatmul.mubr.bf16.gmra.mrb[12].mxu0 %v96_v49 }
  0x73   :  { %813 = vmatprep.mubr.bf16.mxu0 %v97_v50 }
  0x7a   :  { %814 = vmatmul.mubr.bf16.gmra.mrb[16].mxu0 %v98_v55 }
  0x7b   :  { %817 = vmatprep.mubr.bf16.mxu0 %v99_v56 }
  0x82   :  { %818 = vmatmul.mubr.bf16.gmra.mrb[20].mxu0 %v100_v61 }
  0x83   :  { %821 = vmatprep.mubr.bf16.mxu0 %v101_v62  ;;  %v338_v62 = vld [vmem:[#allocation3 + $0x80] sm:$0xff] }
  0x84   :  { %v394_v6 = vpack.c.bf16 %v340_v63, %v338_v62  ;;  %v368_v62 = vld [vmem:[#allocation3 + $0x170] sm:$0xff]  ;;  %v371_v63 = vld [vmem:[#allocation3 + $0x188] sm:$0xff] }
  0x8a   :  { %822 = vmatmul.mubr.bf16.gmra.mrb[24].mxu0 %v102_v3  ;;  %v345_v3 = vld [vmem:[#allocation3 + $0xb8] sm:$0xff] }
  0x8b   :  { %825 = vmatprep.mubr.bf16.mxu0 %v103_v4  ;;  %v327_v4 = vld [vmem:[#allocation3 + $0x28] sm:$0xff]  ;;  %v397_v8 = vpack.c.bf16 %v345_v3, %v343_v0  ;;  %v373_v0 = vld [vmem:[#allocation3 + $0x198] sm:$0xff]  ;;  %v370_v3 = vld [vmem:[#allocation3 + $0x180] sm:$0xff] }
  0x8c   :  { %v389_v9 = vpack.c.bf16 %v329_v5, %v327_v4  ;;  %v372_v4 = vld [vmem:[#allocation3 + $0x190] sm:$0xff]  ;;  %v375_v5 = vld [vmem:[#allocation3 + $0x1a8] sm:$0xff] }
  0x92   :  { %826 = vmatmul.mubr.bf16.gmra.mrb[28].mxu0 %v104_v7  ;;  %v386_v7 = vpack.c.bf16 %v324_v2, %v322_v1  ;;  %v411_v2 = vpack.c.bf16 %v373_v0, %v371_v63 }
  0x93   :  { %466 = vmatprep.mubr.bf16.mxu0 %v387_v13  ;;  %v326_v13 = vld [vmem:[#allocation3 + $0x20] sm:$0xff] }
 0x12d   :  { %v799_v14 = vpop.f32.mrb[0].mxu0 }
 0x12e   :  { %v163_v15 = vpop.f32.mrb[1].mxu0 }
 0x12f   :  { %v800_v16 = vpop.f32.mrb[2].mxu0 }
 0x130   :  { %v291_v17 = vpack.c.bf16 %v800_v16, %v799_v14  ;;  %v166_v18 = vpop.f32.mrb[3].mxu0  ;;  %v328_v14 = vld [vmem:[#allocation3 + $0x30] sm:$0xff]  ;;  %v331_v16 = vld [vmem:[#allocation3 + $0x48] sm:$0xff] }
 0x131   :  { %v290_v19 = vpack.c.bf16 %v166_v18, %v163_v15  ;;  %v349_v15 = vld [vmem:[#allocation3 + $0xd8] sm:$0xff]  ;;  %v396_v18 = vpack.c.bf16 %v344_v11, %v342_v10  ;;  %v376_v10 = vld [vmem:[#allocation3 + $0x1b0] sm:$0xff]  ;;  %v379_v11 = vld [vmem:[#allocation3 + $0x1c8] sm:$0xff] }
 0x135   :  { %v803_v20 = vpop.f32.mrb[4].mxu0 }
 0x136   :  { %v179_v21 = vpop.f32.mrb[5].mxu0 }
 0x137   :  { %v804_v22 = vpop.f32.mrb[6].mxu0 }
 0x138   :  { %v293_v23 = vpack.c.bf16 %v804_v22, %v803_v20  ;;  %v182_v24 = vpop.f32.mrb[7].mxu0  ;;  %v399_v20 = vpack.c.bf16 %v349_v15, %v347_v12  ;;  %v346_v22 = vld [vmem:[#allocation3 + $0xc0] sm:$0xff]  ;;  %v381_v12 = vld [vmem:[#allocation3 + $0x1d8] sm:$0xff] }
 0x139   :  { %v292_v25 = vpack.c.bf16 %v182_v24, %v179_v21  ;;  %v351_v24 = vld [vmem:[#allocation3 + $0xe8] sm:$0xff]  ;;  %v378_v15 = vld [vmem:[#allocation3 + $0x1c0] sm:$0xff] }
 0x13d   :  { %v807_v26 = vpop.f32.mrb[8].mxu0 }
 0x13e   :  { %v195_v27 = vpop.f32.mrb[9].mxu0 }
 0x13f   :  { %v808_v28 = vpop.f32.mrb[10].mxu0 }
 0x140   :  { %v295_v29 = vpack.c.bf16 %v808_v28, %v807_v26  ;;  %v198_v30 = vpop.f32.mrb[11].mxu0  ;;  %v332_v26 = vld [vmem:[#allocation3 + $0x50] sm:$0xff]  ;;  %v335_v28 = vld [vmem:[#allocation3 + $0x68] sm:$0xff] }
 0x141   :  { %v294_v31 = vpack.c.bf16 %v198_v30, %v195_v27  ;;  %v353_v27 = vld [vmem:[#allocation3 + $0xf8] sm:$0xff] }
 0x145   :  { %v811_v32 = vpop.f32.mrb[12].mxu0 }
 0x146   :  { %v211_v33 = vpop.f32.mrb[13].mxu0 }
 0x147   :  { %v812_v34 = vpop.f32.mrb[14].mxu0 }
 0x148   :  { %v1017_v35 = vpack.c.bf16 %v812_v34, %v811_v32  ;;  %v214_v36 = vpop.f32.mrb[15].mxu0  ;;  %v401_v32 = vpack.c.bf16 %v353_v27, %v351_v24  ;;  %v350_v34 = vld [vmem:[#allocation3 + $0xe0] sm:$0xff] }
 0x149   :  { %v296_v37 = vpack.c.bf16 %v214_v36, %v211_v33  ;;  %v334_v36 = vld [vmem:[#allocation3 + $0x60] sm:$0xff] }
 0x14d   :  { %v815_v38 = vpop.f32.mrb[16].mxu0 }
 0x14e   :  { %v227_v39 = vpop.f32.mrb[17].mxu0 }
 0x14f   :  { %v816_v40 = vpop.f32.mrb[18].mxu0 }
 0x150   :  { %v299_v41 = vpack.c.bf16 %v816_v40, %v815_v38  ;;  %v230_v42 = vpop.f32.mrb[19].mxu0  ;;  %v355_v38 = vld [vmem:[#allocation3 + $0x108] sm:$0xff] }
 0x151   :  { %v298_v43 = vpack.c.bf16 %v230_v42, %v227_v39  ;;  %v357_v39 = vld [vmem:[#allocation3 + $0x118] sm:$0xff] }
 0x152   :  { %v403_v42 = vpack.c.bf16 %v357_v39, %v355_v38 }
 0x153   :  { %669 = vmatprep.subr.bf16.mxu0 %v298_v43  ;;  %829 = vmatprep.subr.bf16.mxu1 %v298_v43  ;;  %v354_v43 = vld [vmem:[#allocation3 + $0x100] sm:$0xff] }
 0x154   :  { %670 = vmatpush3.bf16.msra.mxu0 %v290_v19  ;;  %837 = vmatpush3.bf16.msra.mxu1 %v290_v19  ;;  %v388_v19 = vpack.c.bf16 %v328_v14, %v326_v13  ;;  %v415_v14 = vpack.c.bf16 %v381_v12, %v379_v11 }
 0x155   :  { %v819_v44 = vpop.f32.mrb[20].mxu0  ;;  %671 = vmatprep.subr.bf16.mxu0 %v299_v41  ;;  %830 = vmatprep.subr.bf16.mxu1 %v299_v41 }
 0x156   :  { %v243_v45 = vpop.f32.mrb[21].mxu0 }
 0x157   :  { %v820_v46 = vpop.f32.mrb[22].mxu0 }
 0x158   :  { %v301_v47 = vpack.c.bf16 %v820_v46, %v819_v44  ;;  %v246_v48 = vpop.f32.mrb[23].mxu0  ;;  %672 = vmatpush3.bf16.msra.mxu0 %v291_v17  ;;  %838 = vmatpush3.bf16.msra.mxu1 %v291_v17  ;;  %v333_v17 = vld [vmem:[#allocation3 + $0x58] sm:$0xff]  ;;  %v356_v44 = vld [vmem:[#allocation3 + $0x110] sm:$0xff] }
 0x159   :  { %v300_v49 = vpack.c.bf16 %v246_v48, %v243_v45  ;;  %v391_v21 = vpack.c.bf16 %v333_v17, %v331_v16  ;;  %v359_v45 = vld [vmem:[#allocation3 + $0x128] sm:$0xff]  ;;  %v361_v46 = vld [vmem:[#allocation3 + $0x138] sm:$0xff]  ;;  %v380_v16 = vld [vmem:[#allocation3 + $0x1d0] sm:$0xff] }
 0x15a   :  { %v405_v48 = vpack.c.bf16 %v361_v46, %v359_v45  ;;  %v383_v17 = vld [vmem:[#allocation3 + $0x1e8] sm:$0xff] }
 0x15b   :  { %673 = vmatprep.subr.bf16.mxu0 %v300_v49  ;;  %831 = vmatprep.subr.bf16.mxu1 %v300_v49  ;;  %v358_v49 = vld [vmem:[#allocation3 + $0x120] sm:$0xff] }
 0x15c   :  { %674 = vmatpush3.bf16.msra.mxu0 %v292_v25  ;;  %839 = vmatpush3.bf16.msra.mxu1 %v292_v25  ;;  %v330_v25 = vld [vmem:[#allocation3 + $0x40] sm:$0xff] }
 0x15d   :  { %v823_v50 = vpop.f32.mrb[24].mxu0  ;;  %675 = vmatprep.subr.bf16.mxu0 %v301_v47  ;;  %832 = vmatprep.subr.bf16.mxu1 %v301_v47  ;;  %v402_v47 = vpack.c.bf16 %v356_v44, %v354_v43 }
 0x15e   :  { %v259_v51 = vpop.f32.mrb[25].mxu0 }
 0x15f   :  { %v824_v52 = vpop.f32.mrb[26].mxu0 }
 0x160   :  { %v303_v53 = vpack.c.bf16 %v824_v52, %v823_v50  ;;  %v262_v54 = vpop.f32.mrb[27].mxu0  ;;  %676 = vmatpush3.bf16.msra.mxu0 %v293_v23  ;;  %840 = vmatpush3.bf16.msra.mxu1 %v293_v23  ;;  %v348_v23 = vld [vmem:[#allocation3 + $0xd0] sm:$0xff]  ;;  %v365_v52 = vld [vmem:[#allocation3 + $0x158] sm:$0xff] }
 0x161   :  { %v302_v55 = vpack.c.bf16 %v262_v54, %v259_v51  ;;  %v398_v30 = vpack.c.bf16 %v348_v23, %v346_v22  ;;  %v360_v50 = vld [vmem:[#allocation3 + $0x130] sm:$0xff]  ;;  %v363_v51 = vld [vmem:[#allocation3 + $0x148] sm:$0xff] }
 0x162   :  { %v407_v54 = vpack.c.bf16 %v365_v52, %v363_v51  ;;  %v384_v22 = vld [vmem:[#allocation3 + $0x1f0] sm:$0xff] }
 0x163   :  { %677 = vmatprep.subr.bf16.mxu0 %v302_v55  ;;  %833 = vmatprep.subr.bf16.mxu1 %v302_v55  ;;  %v362_v55 = vld [vmem:[#allocation3 + $0x140] sm:$0xff] }
 0x164   :  { %678 = vmatpush3.bf16.msra.mxu0 %v294_v31  ;;  %841 = vmatpush3.bf16.msra.mxu1 %v294_v31  ;;  %v390_v31 = vpack.c.bf16 %v332_v26, %v330_v25 }
 0x165   :  { %v827_v56 = vpop.f32.mrb[28].mxu0  ;;  %679 = vmatprep.subr.bf16.mxu0 %v303_v53  ;;  %834 = vmatprep.subr.bf16.mxu1 %v303_v53  ;;  %v404_v53 = vpack.c.bf16 %v360_v50, %v358_v49 }
 0x166   :  { %v275_v57 = vpop.f32.mrb[29].mxu0 }
 0x167   :  { %v828_v58 = vpop.f32.mrb[30].mxu0 }
 0x168   :  { %v305_v59 = vpack.c.bf16 %v828_v58, %v827_v56  ;;  %v278_v60 = vpop.f32.mrb[31].mxu0  ;;  %680 = vmatpush3.bf16.msra.mxu0 %v295_v29  ;;  %842 = vmatpush3.bf16.msra.mxu1 %v295_v29  ;;  %v337_v29 = vld [vmem:[#allocation3 + $0x78] sm:$0xff]  ;;  %v364_v56 = vld [vmem:[#allocation3 + $0x150] sm:$0xff] }
 0x169   :  { %v304_v61 = vpack.c.bf16 %v278_v60, %v275_v57  ;;  %v393_v33 = vpack.c.bf16 %v337_v29, %v335_v28  ;;  %v367_v57 = vld [vmem:[#allocation3 + $0x168] sm:$0xff]  ;;  %v369_v58 = vld [vmem:[#allocation3 + $0x178] sm:$0xff] }
 0x16a   :  { %v409_v60 = vpack.c.bf16 %v369_v58, %v367_v57 }
 0x16b   :  { %681 = vmatprep.subr.bf16.mxu0 %v304_v61  ;;  %835 = vmatprep.subr.bf16.mxu1 %v304_v61  ;;  %v366_v61 = vld [vmem:[#allocation3 + $0x160] sm:$0xff] }
 0x16c   :  { %682 = vmatpush3.bf16.msra.mxu0 %v296_v37  ;;  %843 = vmatpush3.bf16.msra.mxu1 %v296_v37  ;;  %v336_v37 = vld [vmem:[#allocation3 + $0x70] sm:$0xff]  ;;  %v408_v1 = vpack.c.bf16 %v368_v62, %v366_v61 }
 0x16d   :  { %683 = vmatprep.subr.bf16.mxu0 %v305_v59  ;;  %836 = vmatprep.subr.bf16.mxu1 %v305_v59  ;;  %v392_v41 = vpack.c.bf16 %v336_v37, %v334_v36  ;;  %v406_v59 = vpack.c.bf16 %v364_v56, %v362_v55 }
 0x170   :  { %684 = vmatpush3.bf16.msra.mxu0 %v1017_v35  ;;  %844 = vmatpush3.bf16.msra.mxu1 %v1017_v35  ;;  %v352_v35 = vld [vmem:[#allocation3 + $0xf0] sm:$0xff] }
 0x171   :  { %v400_v40 = vpack.c.bf16 %v352_v35, %v350_v34 }
 0x173   :  { %499 = vmatmul.mubr.bf16.vlgmr.msra.gmra.mrb[0].mxu1 %v394_v6  ;;  %467 = vmatmul.mubr.bf16.vlgmr.msra.gmra.mrb[32].mxu0 %v386_v7  ;;  %v377_v6 = vld [vmem:[#allocation3 + $0x1b8] sm:$0xff]  ;;  %v410_v7 = vpack.c.bf16 %v372_v4, %v370_v3 }
 0x174   :  { %506 = vmatprep.mubr.bf16.mxu1 %v397_v8  ;;  %474 = vmatprep.mubr.bf16.mxu0 %v389_v9  ;;  %v413_v8 = vpack.c.bf16 %v377_v6, %v375_v5  ;;  %v374_v9 = vld [vmem:[#allocation3 + $0x1a0] sm:$0xff] }
 0x175   :  { %v412_v13 = vpack.c.bf16 %v376_v10, %v374_v9 }
 0x17b   :  { %507 = vmatmul.mubr.bf16.gmra.mrb[4].mxu1 %v396_v18  ;;  %475 = vmatmul.mubr.bf16.gmra.mrb[36].mxu0 %v388_v19  ;;  %v385_v18 = vld [vmem:[#allocation3 + $0x1f8] sm:$0xff]  ;;  %v414_v19 = vpack.c.bf16 %v380_v16, %v378_v15 }
 0x17c   :  { %514 = vmatprep.mubr.bf16.mxu1 %v399_v20  ;;  %482 = vmatprep.mubr.bf16.mxu0 %v391_v21  ;;  %v417_v20 = vpack.c.bf16 %v385_v18, %v383_v17  ;;  %v382_v21 = vld [vmem:[#allocation3 + $0x1e0] sm:$0xff] }
 0x17d   :  { %v416_v23 = vpack.c.bf16 %v384_v22, %v382_v21 }
 0x183   :  { %515 = vmatmul.mubr.bf16.gmra.mrb[8].mxu1 %v398_v30  ;;  %483 = vmatmul.mubr.bf16.gmra.mrb[40].mxu0 %v390_v31 }
 0x184   :  { %522 = vmatprep.mubr.bf16.mxu1 %v401_v32  ;;  %490 = vmatprep.mubr.bf16.mxu0 %v393_v33 }
 0x18b   :  { %523 = vmatmul.mubr.bf16.gmra.mrb[12].mxu1 %v400_v40  ;;  %491 = vmatmul.mubr.bf16.gmra.mrb[44].mxu0 %v392_v41 }
 0x18c   :  { %530 = vmatprep.mubr.bf16.mxu1 %v403_v42 }
 0x193   :  { %531 = vmatmul.mubr.bf16.gmra.mrb[16].mxu1 %v402_v47 }
 0x194   :  { %538 = vmatprep.mubr.bf16.mxu1 %v405_v48 }
 0x19b   :  { %539 = vmatmul.mubr.bf16.gmra.mrb[20].mxu1 %v404_v53 }
 0x19c   :  { %546 = vmatprep.mubr.bf16.mxu1 %v407_v54 }
 0x1a3   :  { %547 = vmatmul.mubr.bf16.gmra.mrb[24].mxu1 %v406_v59 }
 0x1a4   :  { %554 = vmatprep.mubr.bf16.mxu1 %v409_v60 }
 0x1ab   :  { %555 = vmatmul.mubr.bf16.gmra.mrb[28].mxu1 %v408_v1 }
 0x1ac   :  { %562 = vmatprep.mubr.bf16.mxu1 %v411_v2 }
 0x1b3   :  { %563 = vmatmul.mubr.bf16.gmra.mrb[32].mxu1 %v410_v7 }
 0x1b4   :  { %570 = vmatprep.mubr.bf16.mxu1 %v413_v8 }
 0x1bb   :  { %571 = vmatmul.mubr.bf16.gmra.mrb[36].mxu1 %v412_v13 }
 0x1bc   :  { %578 = vmatprep.mubr.bf16.mxu1 %v415_v14 }
 0x1c3   :  { %579 = vmatmul.mubr.bf16.gmra.mrb[40].mxu1 %v414_v19 }
 0x1c4   :  { %586 = vmatprep.mubr.bf16.mxu1 %v417_v20 }
 0x1cb   :  { %587 = vmatmul.mubr.bf16.gmra.mrb[44].mxu1 %v416_v23 }
 0x246   :  { %v709_v24 = vpop.f32.mrb[0].mxu1  ;;  %v685_v25 = vpop.f32.mrb[32].mxu0 }
 0x247   :  { %v710_v26 = vpop.f32.mrb[1].mxu1  ;;  %v686_v27 = vpop.f32.mrb[33].mxu0 }
 0x248   :  { %v711_v28 = vadd.f32 %v710_v26, %v709_v24  ;;  %v712_v29 = vpop.f32.mrb[2].mxu1  ;;  %v687_v30 = vadd.f32 %v686_v27, %v685_v25  ;;  %v688_v31 = vpop.f32.mrb[34].mxu0 }
 0x249   :  { %v713_v32 = vpop.f32.mrb[3].mxu1  ;;  %v689_v33 = vpop.f32.mrb[35].mxu0 }
 0x24a   :  { %603 = vst [vmem:[#allocation9 + $0x40] sm:$0xff] %v711_v28  ;;  %v714_v34 = vadd.f32 %v713_v32, %v712_v29  ;;  %595 = vst [vmem:[#allocation9] sm:$0xff] %v687_v30  ;;  %v690_v35 = vadd.f32 %v689_v33, %v688_v31 }
 0x24c   :  { %604 = vst [vmem:[#allocation9 + $0x48] sm:$0xff] %v714_v34  ;;  %596 = vst [vmem:[#allocation9 + $0x8] sm:$0xff] %v690_v35 }
 0x24e   :  { %v715_v36 = vpop.f32.mrb[4].mxu1  ;;  %v691_v37 = vpop.f32.mrb[36].mxu0 }
 0x24f   :  { %v716_v38 = vpop.f32.mrb[5].mxu1  ;;  %v692_v39 = vpop.f32.mrb[37].mxu0 }
 0x250   :  { %v717_v40 = vadd.f32 %v716_v38, %v715_v36  ;;  %v718_v41 = vpop.f32.mrb[6].mxu1  ;;  %v693_v42 = vadd.f32 %v692_v39, %v691_v37  ;;  %v694_v43 = vpop.f32.mrb[38].mxu0 }
 0x251   :  { %v719_v44 = vpop.f32.mrb[7].mxu1  ;;  %v695_v45 = vpop.f32.mrb[39].mxu0 }
 0x252   :  { %605 = vst [vmem:[#allocation9 + $0x50] sm:$0xff] %v717_v40  ;;  %v720_v46 = vadd.f32 %v719_v44, %v718_v41  ;;  %597 = vst [vmem:[#allocation9 + $0x10] sm:$0xff] %v693_v42  ;;  %v696_v47 = vadd.f32 %v695_v45, %v694_v43 }
 0x254   :  { %606 = vst [vmem:[#allocation9 + $0x58] sm:$0xff] %v720_v46  ;;  %598 = vst [vmem:[#allocation9 + $0x18] sm:$0xff] %v696_v47 }
 0x256   :  { %v721_v48 = vpop.f32.mrb[8].mxu1  ;;  %v697_v49 = vpop.f32.mrb[40].mxu0 }
 0x257   :  { %v722_v50 = vpop.f32.mrb[9].mxu1  ;;  %v698_v51 = vpop.f32.mrb[41].mxu0 }
 0x258   :  { %v723_v52 = vadd.f32 %v722_v50, %v721_v48  ;;  %v724_v53 = vpop.f32.mrb[10].mxu1  ;;  %v699_v54 = vadd.f32 %v698_v51, %v697_v49  ;;  %v700_v55 = vpop.f32.mrb[42].mxu0 }
 0x259   :  { %v725_v56 = vpop.f32.mrb[11].mxu1  ;;  %v701_v57 = vpop.f32.mrb[43].mxu0 }
 0x25a   :  { %607 = vst [vmem:[#allocation9 + $0x60] sm:$0xff] %v723_v52  ;;  %v726_v58 = vadd.f32 %v725_v56, %v724_v53  ;;  %599 = vst [vmem:[#allocation9 + $0x20] sm:$0xff] %v699_v54  ;;  %v702_v59 = vadd.f32 %v701_v57, %v700_v55 }
 0x25c   :  { %608 = vst [vmem:[#allocation9 + $0x68] sm:$0xff] %v726_v58  ;;  %600 = vst [vmem:[#allocation9 + $0x28] sm:$0xff] %v702_v59 }
 0x25e   :  { %v727_v60 = vpop.f32.mrb[12].mxu1  ;;  %v703_v61 = vpop.f32.mrb[44].mxu0 }
 0x25f   :  { %v728_v62 = vpop.f32.mrb[13].mxu1  ;;  %v704_v63 = vpop.f32.mrb[45].mxu0 }
 0x260   :  { %v729_v0 = vadd.f32 %v728_v62, %v727_v60  ;;  %v730_v1 = vpop.f32.mrb[14].mxu1  ;;  %v705_v2 = vadd.f32 %v704_v63, %v703_v61  ;;  %v706_v3 = vpop.f32.mrb[46].mxu0 }
 0x261   :  { %v731_v4 = vpop.f32.mrb[15].mxu1  ;;  %v707_v5 = vpop.f32.mrb[47].mxu0 }
 0x262   :  { %609 = vst [vmem:[#allocation9 + $0x70] sm:$0xff] %v729_v0  ;;  %v732_v6 = vadd.f32 %v731_v4, %v730_v1  ;;  %601 = vst [vmem:[#allocation9 + $0x30] sm:$0xff] %v705_v2  ;;  %v708_v7 = vadd.f32 %v707_v5, %v706_v3 }
 0x264   :  { %610 = vst [vmem:[#allocation9 + $0x78] sm:$0xff] %v732_v6  ;;  %602 = vst [vmem:[#allocation9 + $0x38] sm:$0xff] %v708_v7 }
 0x266   :  { %v733_v8 = vpop.f32.mrb[16].mxu1 }
 0x267   :  { %v734_v9 = vpop.f32.mrb[17].mxu1 }
 0x268   :  { %v735_v10 = vadd.f32 %v734_v9, %v733_v8  ;;  %v736_v11 = vpop.f32.mrb[18].mxu1 }
 0x269   :  { %v737_v12 = vpop.f32.mrb[19].mxu1 }
 0x26a   :  { %611 = vst [vmem:[#allocation9 + $0x80] sm:$0xff] %v735_v10  ;;  %v738_v13 = vadd.f32 %v737_v12, %v736_v11 }
 0x26c   :  { %612 = vst [vmem:[#allocation9 + $0x88] sm:$0xff] %v738_v13 }
 0x26e   :  { %v739_v14 = vpop.f32.mrb[20].mxu1 }
 0x26f   :  { %v740_v15 = vpop.f32.mrb[21].mxu1 }
 0x270   :  { %v741_v16 = vadd.f32 %v740_v15, %v739_v14  ;;  %v742_v17 = vpop.f32.mrb[22].mxu1 }
 0x271   :  { %v743_v18 = vpop.f32.mrb[23].mxu1 }
 0x272   :  { %613 = vst [vmem:[#allocation9 + $0x90] sm:$0xff] %v741_v16  ;;  %v744_v19 = vadd.f32 %v743_v18, %v742_v17 }
 0x274   :  { %614 = vst [vmem:[#allocation9 + $0x98] sm:$0xff] %v744_v19 }
 0x276   :  { %v745_v20 = vpop.f32.mrb[24].mxu1 }
 0x277   :  { %v746_v21 = vpop.f32.mrb[25].mxu1 }
 0x278   :  { %v747_v22 = vadd.f32 %v746_v21, %v745_v20  ;;  %v748_v23 = vpop.f32.mrb[26].mxu1 }
 0x279   :  { %v749_v24 = vpop.f32.mrb[27].mxu1 }
 0x27a   :  { %615 = vst [vmem:[#allocation9 + $0xa0] sm:$0xff] %v747_v22  ;;  %v750_v25 = vadd.f32 %v749_v24, %v748_v23 }
 0x27c   :  { %616 = vst [vmem:[#allocation9 + $0xa8] sm:$0xff] %v750_v25 }
 0x27e   :  { %v751_v26 = vpop.f32.mrb[28].mxu1 }
 0x27f   :  { %v752_v27 = vpop.f32.mrb[29].mxu1 }
 0x280   :  { %v753_v28 = vadd.f32 %v752_v27, %v751_v26  ;;  %v754_v29 = vpop.f32.mrb[30].mxu1 }
 0x281   :  { %v755_v30 = vpop.f32.mrb[31].mxu1 }
 0x282   :  { %617 = vst [vmem:[#allocation9 + $0xb0] sm:$0xff] %v753_v28  ;;  %v756_v31 = vadd.f32 %v755_v30, %v754_v29 }
 0x284   :  { %618 = vst [vmem:[#allocation9 + $0xb8] sm:$0xff] %v756_v31 }
 0x286   :  { %v757_v32 = vpop.f32.mrb[32].mxu1 }
 0x287   :  { %v758_v33 = vpop.f32.mrb[33].mxu1 }
 0x288   :  { %v759_v34 = vadd.f32 %v758_v33, %v757_v32  ;;  %v760_v35 = vpop.f32.mrb[34].mxu1 }
 0x289   :  { %v761_v36 = vpop.f32.mrb[35].mxu1 }
 0x28a   :  { %619 = vst [vmem:[#allocation9 + $0xc0] sm:$0xff] %v759_v34  ;;  %v762_v37 = vadd.f32 %v761_v36, %v760_v35 }
 0x28c   :  { %620 = vst [vmem:[#allocation9 + $0xc8] sm:$0xff] %v762_v37 }
 0x28e   :  { %v763_v38 = vpop.f32.mrb[36].mxu1 }
 0x28f   :  { %v764_v39 = vpop.f32.mrb[37].mxu1 }
 0x290   :  { %v765_v40 = vadd.f32 %v764_v39, %v763_v38  ;;  %v766_v41 = vpop.f32.mrb[38].mxu1 }
 0x291   :  { %v767_v42 = vpop.f32.mrb[39].mxu1 }
 0x292   :  { %621 = vst [vmem:[#allocation9 + $0xd0] sm:$0xff] %v765_v40  ;;  %v768_v43 = vadd.f32 %v767_v42, %v766_v41 }
 0x294   :  { %622 = vst [vmem:[#allocation9 + $0xd8] sm:$0xff] %v768_v43 }
 0x296   :  { %v769_v44 = vpop.f32.mrb[40].mxu1 }
 0x297   :  { %v770_v45 = vpop.f32.mrb[41].mxu1 }
 0x298   :  { %v771_v46 = vadd.f32 %v770_v45, %v769_v44  ;;  %v772_v47 = vpop.f32.mrb[42].mxu1 }
 0x299   :  { %v773_v48 = vpop.f32.mrb[43].mxu1 }
 0x29a   :  { %623 = vst [vmem:[#allocation9 + $0xe0] sm:$0xff] %v771_v46  ;;  %v774_v49 = vadd.f32 %v773_v48, %v772_v47 }
 0x29c   :  { %624 = vst [vmem:[#allocation9 + $0xe8] sm:$0xff] %v774_v49 }
 0x29e   :  { %v775_v50 = vpop.f32.mrb[44].mxu1 }
 0x29f   :  { %v776_v51 = vpop.f32.mrb[45].mxu1 }
 0x2a0   :  { %v777_v52 = vadd.f32 %v776_v51, %v775_v50  ;;  %v778_v53 = vpop.f32.mrb[46].mxu1 }
 0x2a1   :  { %v779_v54 = vpop.f32.mrb[47].mxu1 }
 0x2a2   :  { %625 = vst [vmem:[#allocation9 + $0xf0] sm:$0xff] %v777_v52  ;;  %v780_v55 = vadd.f32 %v779_v54, %v778_v53 }
 0x2a4   :  { %626 = vst [vmem:[#allocation9 + $0xf8] sm:$0xff] %v780_v55 }
 0x2a5   :  { %930 = shalt.err (!%p927_p0)
}
 0x2a6   :  { %s931_s29 = scalar_lea.hbm %s1039_s3, 4096 }
 0x2a7   :  { %p932_p1 = scmp.ne.s32.totalorder %s1039_s3, %s931_s29  ;;  %p935_p2 = scmp.lt.u32.totalorder %s931_s29, %s1039_s3 }
 0x2a9   :  { %p937_p3 = pnand %p935_p2, %p932_p1 }
 0x2ab   :  { %940 = shalt.err (!%p937_p3)
}
 0x2ac   :  { %638 = dma.vmem_to_hbm [thread:$0]  %s633_s25, 4096, %s1039_s3, [#allocation5], %s948_s22, %s948_s22, %s949_s23  }
 0x2ad   :  { %945 = dma.done.wait [#allocation5], 4096  }
 0x2ae   :  { %946 = vsyncadd [#allocation5], 4294963200 }
 0x2af   :  { %642 = vsyncpa [#allocation4], 1 }
 0x2b0   :  { %643 = vsyncpa [#allocation7], 1 }
 0x2b1   :  { %644 = vsyncpa [#allocation5], 1 }

</bundles_post_ra>
